<compile_context>
chip_gen: v6e
topology: v6e:2x2x1
jax: 0.10.0
libtpu: 0.0.40
codegen_flags: <defaults>
</compile_context>

<pallas_src>
import jax
import jax.numpy as jnp
from jax.experimental import pallas as pl
from jax.experimental.pallas import tpu as pltpu


# ----------------------------------------------------------------------------
# Tiling helpers
# ----------------------------------------------------------------------------

def _pick_tile(dim, target, unit):
    """Largest tile <= target that divides `dim` and is a multiple of `unit`
    (or the full dim if dim <= target).  Returns (tile, padded_dim)."""
    if dim <= target:
        return dim, dim
    t = (target // unit) * unit
    while t >= unit:
        if dim % t == 0:
            return t, dim
        t -= unit
    # No clean divisor: pad up to a multiple of `target` (costs one copy).
    padded = ((dim + target - 1) // target) * target
    return target, padded


def _pick_k_tile(K, target=512):
    """Reduction-axis tile for the GEMM (must be a multiple of 128 or == K)."""
    if K <= target:
        return K
    for t in (512, 384, 256, 128):
        if t <= target and K % t == 0:
            return t
    # Ragged large K (e.g. 9*64=576): keep whole; still a small VMEM block.
    return K


def _ew_row_tile(M, target=512):
    """Row tile (multiple of 8, divides M) for the memory-bound elementwise /
    reduction kernels."""
    if M <= target:
        return M
    t = (target // 8) * 8
    while t >= 8:
        if M % t == 0:
            return t
        t -= 8
    return M  # pathological M: single block (never hit for ResNet50 shapes)


# ----------------------------------------------------------------------------
# Pallas kernels
# ----------------------------------------------------------------------------

def _matmul_kernel(a_ref, w_ref, o_ref, acc_ref):
    @pl.when(pl.program_id(2) == 0)
    def _init():
        acc_ref[...] = jnp.zeros_like(acc_ref)

    acc_ref[...] += jnp.dot(a_ref[...], w_ref[...],
                            preferred_element_type=jnp.float32)

    @pl.when(pl.program_id(2) == pl.num_programs(2) - 1)
    def _done():
        o_ref[...] = acc_ref[...]


def matmul(a, w, *, tm_target=256, tn_target=256, tk_target=512):
    """bf16 GEMM  [M,K] @ [K,N] -> f32 [M,N], tiled over (M, N, K) with an
    f32 VMEM accumulator (MXU hot path)."""
    M, K = a.shape
    K2, N = w.shape
    assert K == K2, (K, K2)
    a = a.astype(jnp.bfloat16)
    w = w.astype(jnp.bfloat16)

    tm, Mp = _pick_tile(M, tm_target, 8)
    tn, Np = _pick_tile(N, tn_target, 128)
    tk = _pick_k_tile(K, tk_target)

    if Mp != M:
        a = jnp.pad(a, ((0, Mp - M), (0, 0)))
    if Np != N:
        w = jnp.pad(w, ((0, 0), (0, Np - N)))
    assert Mp % tm == 0 and Np % tn == 0 and K % tk == 0, (Mp, tm, Np, tn, K, tk)

    grid = (Mp // tm, Np // tn, K // tk)
    out = pl.pallas_call(
        _matmul_kernel,
        out_shape=jax.ShapeDtypeStruct((Mp, Np), jnp.float32),
        grid=grid,
        in_specs=[pl.BlockSpec((tm, tk), lambda i, j, k: (i, k)),
                  pl.BlockSpec((tk, tn), lambda i, j, k: (k, j))],
        out_specs=pl.BlockSpec((tm, tn), lambda i, j, k: (i, j)),
        scratch_shapes=[pltpu.VMEM((tm, tn), jnp.float32)],
        compiler_params=pltpu.CompilerParams(
            dimension_semantics=("parallel", "parallel", "arbitrary")),
    )(a, w)
    if Mp != M or Np != N:
        out = out[:M, :N]
    return out


def _bn_stats_kernel(x_ref, o_ref):
    @pl.when(pl.program_id(0) == 0)
    def _init():
        o_ref[...] = jnp.zeros_like(o_ref)
    x = x_ref[...]
    o_ref[0:1, :] += jnp.sum(x, axis=0, keepdims=True)
    o_ref[1:2, :] += jnp.sum(x * x, axis=0, keepdims=True)


def bn_scale_shift(x2d, gamma, beta, eps=1e-5):
    """Train-mode BatchNorm over the batch axis of a [M, C] slab, folded to a
    per-channel (scale, shift):  y = x*scale + shift."""
    M, C = x2d.shape
    tm = _ew_row_tile(M)
    stats = pl.pallas_call(
        _bn_stats_kernel,
        out_shape=jax.ShapeDtypeStruct((2, C), jnp.float32),
        grid=(M // tm,),
        in_specs=[pl.BlockSpec((tm, C), lambda i: (i, 0))],
        out_specs=pl.BlockSpec((2, C), lambda i: (0, 0)),
        compiler_params=pltpu.CompilerParams(
            dimension_semantics=("arbitrary",)),
    )(x2d.astype(jnp.float32))
    mean = stats[0] / M
    var = jnp.maximum(stats[1] / M - mean * mean, 0.0)   # guard cancellation
    scale = gamma * jax.lax.rsqrt(var + eps)
    shift = beta - mean * scale
    return scale, shift


def _affine_relu_kernel(x_ref, s_ref, b_ref, o_ref):
    y = x_ref[...].astype(jnp.float32) * s_ref[...] + b_ref[...]
    o_ref[...] = jnp.maximum(y, 0.0).astype(o_ref.dtype)


def _affine_kernel(x_ref, s_ref, b_ref, o_ref):
    y = x_ref[...].astype(jnp.float32) * s_ref[...] + b_ref[...]
    o_ref[...] = y.astype(o_ref.dtype)


def _affine_add_relu_kernel(x_ref, sx_ref, bx_ref, r_ref, sr_ref, br_ref, o_ref):
    y = (x_ref[...].astype(jnp.float32) * sx_ref[...] + bx_ref[...]
         + r_ref[...].astype(jnp.float32) * sr_ref[...] + br_ref[...])
    o_ref[...] = jnp.maximum(y, 0.0).astype(o_ref.dtype)


def affine(x2d, scale, shift, *, relu, out_dtype=jnp.bfloat16):
    """y = (relu?)(x*scale + shift), tiled over rows."""
    M, C = x2d.shape
    tm = _ew_row_tile(M)
    mat = pl.BlockSpec((tm, C), lambda i: (i, 0))
    vec = pl.BlockSpec((1, C), lambda i: (0, 0))
    kern = _affine_relu_kernel if relu else _affine_kernel
    return pl.pallas_call(
        kern,
        out_shape=jax.ShapeDtypeStruct((M, C), out_dtype),
        grid=(M // tm,),
        in_specs=[mat, vec, vec],
        out_specs=mat,
        compiler_params=pltpu.CompilerParams(
            dimension_semantics=("parallel",)),
    )(x2d, scale.reshape(1, C), shift.reshape(1, C))


def affine_add_relu(x2d, sx, bx, r2d, sr, br, *, out_dtype=jnp.bfloat16):
    """Fused BN3 + shortcut-BN + residual add + ReLU:
       y = relu(x*sx + bx + r*sr + br), tiled over rows."""
    M, C = x2d.shape
    tm = _ew_row_tile(M)
    mat = pl.BlockSpec((tm, C), lambda i: (i, 0))
    vec = pl.BlockSpec((1, C), lambda i: (0, 0))
    return pl.pallas_call(
        _affine_add_relu_kernel,
        out_shape=jax.ShapeDtypeStruct((M, C), out_dtype),
        grid=(M // tm,),
        in_specs=[mat, vec, vec, mat, vec, vec],
        out_specs=mat,
        compiler_params=pltpu.CompilerParams(
            dimension_semantics=("parallel",)),
    )(x2d, sx.reshape(1, C), bx.reshape(1, C),
      r2d, sr.reshape(1, C), br.reshape(1, C))


def bn_act(x2d, gamma, beta, *, relu=True, out_dtype=jnp.bfloat16):
    scale, shift = bn_scale_shift(x2d, gamma, beta)
    return affine(x2d, scale, shift, relu=relu, out_dtype=out_dtype)


def _max9_kernel(t0, t1, t2, t3, t4, t5, t6, t7, t8, o_ref):
    m = t0[...]
    for t in (t1, t2, t3, t4, t5, t6, t7, t8):
        m = jnp.maximum(m, t[...])
    o_ref[...] = m


def maxpool3x3s2(x):
    """3x3 / stride-2 / pad-1 max pool (nn.MaxPool2d(3, 2, 1)) on NHWC.
    The nine taps feed a tiled running-max kernel as separate inputs (no
    (9, M, C) stack materialized in HBM)."""
    N, H, W, C = x.shape
    k, stride, pad = 3, 2, 1
    Ho = (H + 2 * pad - k) // stride + 1
    Wo = (W + 2 * pad - k) // stride + 1
    xp = jnp.pad(x, ((0, 0), (pad, pad), (pad, pad), (0, 0)),
                 constant_values=-jnp.inf)
    taps = []
    for i in range(k):
        for j in range(k):
            taps.append(xp[:, i:i + stride * Ho:stride,
                           j:j + stride * Wo:stride, :].reshape(N * Ho * Wo, C))
    M = N * Ho * Wo
    tm = _ew_row_tile(M)
    mat = pl.BlockSpec((tm, C), lambda i: (i, 0))
    out2d = pl.pallas_call(
        _max9_kernel,
        out_shape=jax.ShapeDtypeStruct((M, C), x.dtype),
        grid=(M // tm,),
        in_specs=[mat] * 9,
        out_specs=mat,
        compiler_params=pltpu.CompilerParams(
            dimension_semantics=("parallel",)),
    )(*taps)
    return out2d.reshape(N, Ho, Wo, C)


def _avgpool_kernel(x_ref, o_ref):
    x = x_ref[...].astype(jnp.float32)                 # (1, HW, C)
    o_ref[...] = jnp.mean(x, axis=1, keepdims=True)    # (1, 1, C)


def global_avgpool(x):
    """AdaptiveAvgPool2d((1,1)) + squeeze -> [N, C] (f32), tiled over N."""
    N, H, W, C = x.shape
    HW = H * W
    out = pl.pallas_call(
        _avgpool_kernel,
        out_shape=jax.ShapeDtypeStruct((N, 1, C), jnp.float32),
        grid=(N,),
        in_specs=[pl.BlockSpec((1, HW, C), lambda n: (n, 0, 0))],
        out_specs=pl.BlockSpec((1, 1, C), lambda n: (n, 0, 0)),
        compiler_params=pltpu.CompilerParams(
            dimension_semantics=("parallel",)),
    )(x.reshape(N, HW, C))
    return out.reshape(N, C)


# ----------------------------------------------------------------------------
# Plain-JAX glue: im2col patch extraction (data movement only, kept in bf16)
# ----------------------------------------------------------------------------

def im2col(x, kh, kw, stride, pad):
    """x: [N, H, W, C] (bf16) -> ([N*Ho*Wo, kh*kw*C] bf16, Ho, Wo).
    # TODO(synk): fold the kh*kw tap accumulation into the GEMM kernel itself
    # (shifted in-VMEM windows / manual halo DMA) to avoid materializing the
    # patch matrix through HBM at all."""
    N, H, W, C = x.shape
    if pad > 0:
        x = jnp.pad(x, ((0, 0), (pad, pad), (pad, pad), (0, 0)))
    Ho = (H + 2 * pad - kh) // stride + 1
    Wo = (W + 2 * pad - kw) // stride + 1
    cols = []
    for i in range(kh):
        for j in range(kw):
            cols.append(x[:, i:i + stride * Ho:stride,
                          j:j + stride * Wo:stride, :])
    patches = jnp.stack(cols, axis=3)                  # [N, Ho, Wo, kh*kw, C]
    return patches.reshape(N * Ho * Wo, kh * kw * C), Ho, Wo


# ----------------------------------------------------------------------------
# Parameter construction (deterministic, synthetic; bf16 weights)
# ----------------------------------------------------------------------------

def init_conv(key, kh, kw, cin, cout):
    fan_in = kh * kw * cin
    w = jax.random.normal(key, (kh * kw * cin, cout), jnp.float32)
    return (w * (2.0 / fan_in) ** 0.5).astype(jnp.bfloat16)


def build_params(key):
    keys = iter(jax.random.split(key, 128))
    params = {
        'conv1': init_conv(next(keys), 7, 7, 3, 64),
        'bn1_g': jnp.ones((64,), jnp.float32),
        'bn1_b': jnp.zeros((64,), jnp.float32),
    }
    layers_cfg = [(3, 64, 1), (4, 128, 2), (6, 256, 2), (3, 512, 2)]
    inplanes = 64
    layers = []
    for nblocks, planes, stride in layers_cfg:
        blocks = []
        for bi in range(nblocks):
            s = stride if bi == 0 else 1
            outp = planes * 4
            blk = {
                'stride': s,
                'w1': init_conv(next(keys), 1, 1, inplanes, planes),
                'g1': jnp.ones((planes,), jnp.float32),
                'b1': jnp.zeros((planes,), jnp.float32),
                'w2': init_conv(next(keys), 3, 3, planes, planes),
                'g2': jnp.ones((planes,), jnp.float32),
                'b2': jnp.zeros((planes,), jnp.float32),
                'w3': init_conv(next(keys), 1, 1, planes, outp),
                'g3': jnp.ones((outp,), jnp.float32),
                'b3': jnp.zeros((outp,), jnp.float32),
                'downsample': None,
            }
            if bi == 0 and (s != 1 or inplanes != outp):
                blk['downsample'] = {
                    'w': init_conv(next(keys), 1, 1, inplanes, outp),
                    'g': jnp.ones((outp,), jnp.float32),
                    'b': jnp.zeros((outp,), jnp.float32),
                }
            blocks.append(blk)
            inplanes = outp
        layers.append(blocks)
    params['layers'] = layers
    return params


# ----------------------------------------------------------------------------
# Network forward
# ----------------------------------------------------------------------------

def bottleneck(x, p):
    """torchvision Bottleneck (v1.5: stride lives on the 3x3 conv).
    BN3 + shortcut-BN + residual add + ReLU are fused into one kernel."""
    N, H, W, C = x.shape
    s = p['stride']
    # conv1 1x1 -> bn1 -> relu
    y = matmul(x.reshape(N * H * W, C), p['w1'])
    y = bn_act(y, p['g1'], p['b1'], relu=True)
    # conv2 3x3 / stride s / pad 1 -> bn2 -> relu
    patches, Ho, Wo = im2col(y.reshape(N, H, W, -1), 3, 3, s, 1)
    y = matmul(patches, p['w2'])
    y = bn_act(y, p['g2'], p['b2'], relu=True)
    # conv3 1x1 (its BN is folded into the fused tail below)
    y = matmul(y, p['w3'])                       # f32 [N*Ho*Wo, 4*planes]
    s3, b3 = bn_scale_shift(y, p['g3'], p['b3'])
    # shortcut branch
    if p['downsample'] is not None:
        xs = x[:, ::s, ::s, :]                   # 1x1 conv with stride s
        r = matmul(xs.reshape(N * Ho * Wo, C), p['downsample']['w'])
        sr, br = bn_scale_shift(r, p['downsample']['g'], p['downsample']['b'])
    else:
        r = x.reshape(N * H * W, C)              # identity (bf16)
        Cout = y.shape[1]
        sr = jnp.ones((Cout,), jnp.float32)
        br = jnp.zeros((Cout,), jnp.float32)
    out = affine_add_relu(y, s3, b3, r, sr, br)
    return out.reshape(N, Ho, Wo, -1)


def resnet50_forward(x_nchw, params):
    # NCHW (PyTorch layout) -> NHWC; bf16 activations between kernels.
    x = jnp.transpose(x_nchw, (0, 2, 3, 1)).astype(jnp.bfloat16)
    N = x.shape[0]
    # stem: conv 7x7/s2/p3 -> BN -> ReLU -> maxpool 3x3/s2/p1
    patches, Ho, Wo = im2col(x, 7, 7, 2, 3)      # K=147 kept whole (full-dim block)
    h = matmul(patches, params['conv1'])
    h = bn_act(h, params['bn1_g'], params['bn1_b'], relu=True)
    h = maxpool3x3s2(h.reshape(N, Ho, Wo, -1))
    # residual stages
    for layer in params['layers']:
        for block in layer:
            h = bottleneck(h, block)
    # adaptive average pool to 1x1 + squeeze -> [N, 2048]
    return global_avgpool(h)


# ----------------------------------------------------------------------------

if __name__ == "__main__":
    key = jax.random.PRNGKey(0)
    pkey, xkey = jax.random.split(key)
    params = build_params(pkey)
    # small NCHW image input; 32x32 spatial -> 1x1 before the global avg pool.
    x = jax.random.normal(xkey, (2, 3, 32, 32), jnp.float32)
    out = resnet50_forward(x, params)
    out = jax.block_until_ready(out)
    assert out.shape == (2, 2048), out.shape
    assert bool(jnp.all(jnp.isfinite(out)))
    print("KERNEL_OK")
</pallas_src>

<mosaic_0001>
module attributes {stable_mosaic.version = 11 : i64} {
  func.func @_matmul_kernel(%arg0: i32, %arg1: i32, %arg2: i32, %arg3: memref<256x147xbf16, #tpu.memory_space<vmem>>, %arg4: memref<147x64xbf16, #tpu.memory_space<vmem>>, %arg5: memref<256x64xf32, #tpu.memory_space<vmem>>, %arg6: memref<256x64xf32, #tpu.memory_space<vmem>>) attributes {dimension_semantics = [#tpu.dimension_semantics<parallel>, #tpu.dimension_semantics<parallel>, #tpu.dimension_semantics<arbitrary>], iteration_bounds = array<i64: 2, 1, 1>, scalar_prefetch = 0 : i64, scratch_operands = 1 : i64, tpu.core_type = #tpu.core_type<tc>, window_params = [{transform_indices = @transform_0, window_bounds = array<i64: 256, 147>}, {transform_indices = @transform_1, window_bounds = array<i64: 147, 64>}, {transform_indices = @transform_2, window_bounds = array<i64: 256, 64>}]} {
    %c0_i32 = arith.constant 0 : i32
    %0 = arith.cmpi eq, %arg2, %c0_i32 : i32
    %1 = arith.extui %0 : i1 to i32
    %c0_i32_0 = arith.constant 0 : i32
    %2 = arith.cmpi ne, %1, %c0_i32_0 : i32
    scf.if %2 {
      %cst_10 = arith.constant 0.000000e+00 : f32
      %12 = vector.broadcast %cst_10 : f32 to vector<256x64xf32>
      %c0_11 = arith.constant 0 : index
      %c0_12 = arith.constant 0 : index
      %13 = vector.load %arg6[%c0_11, %c0_12] : memref<256x64xf32, #tpu.memory_space<vmem>>, vector<256x64xf32>
      tpu.vector_store %arg6[%c0_11, %c0_12], %12 {strides = array<i32>} : memref<256x64xf32, #tpu.memory_space<vmem>>, vector<256x64xf32>,
    } else {
    }
    %c0 = arith.constant 0 : index
    %c0_1 = arith.constant 0 : index
    %3 = vector.load %arg6[%c0, %c0_1] : memref<256x64xf32, #tpu.memory_space<vmem>>, vector<256x64xf32>
    %c0_2 = arith.constant 0 : index
    %c0_3 = arith.constant 0 : index
    %4 = vector.load %arg3[%c0_2, %c0_3] : memref<256x147xbf16, #tpu.memory_space<vmem>>, vector<256x147xbf16>
    %c0_4 = arith.constant 0 : index
    %c0_5 = arith.constant 0 : index
    %5 = vector.load %arg4[%c0_4, %c0_5] : memref<147x64xbf16, #tpu.memory_space<vmem>>, vector<147x64xbf16>
    %cst = arith.constant dense<0.000000e+00> : vector<256x64xf32>
    %6 = tpu.matmul %4, %5, %cst {dimension_numbers = #tpu.dot_dimension_numbers<[1], [0], [0], [1], [0, 0, 1, 1], [], []>} : vector<256x147xbf16>, vector<147x64xbf16>, vector<256x64xf32> -> vector<256x64xf32>
    %7 = arith.addf %3, %6 : vector<256x64xf32>
    %c0_6 = arith.constant 0 : index
    %c0_7 = arith.constant 0 : index
    %8 = vector.load %arg6[%c0_6, %c0_7] : memref<256x64xf32, #tpu.memory_space<vmem>>, vector<256x64xf32>
    tpu.vector_store %arg6[%c0_6, %c0_7], %7 {strides = array<i32>} : memref<256x64xf32, #tpu.memory_space<vmem>>, vector<256x64xf32>,
    %c0_i32_8 = arith.constant 0 : i32
    %9 = arith.cmpi eq, %arg2, %c0_i32_8 : i32
    %10 = arith.extui %9 : i1 to i32
    %c0_i32_9 = arith.constant 0 : i32
    %11 = arith.cmpi ne, %10, %c0_i32_9 : i32
    scf.if %11 {
      %c0_10 = arith.constant 0 : index
      %c0_11 = arith.constant 0 : index
      %12 = vector.load %arg6[%c0_10, %c0_11] : memref<256x64xf32, #tpu.memory_space<vmem>>, vector<256x64xf32>
      %c0_12 = arith.constant 0 : index
      %c0_13 = arith.constant 0 : index
      %13 = vector.load %arg5[%c0_12, %c0_13] : memref<256x64xf32, #tpu.memory_space<vmem>>, vector<256x64xf32>
      tpu.vector_store %arg5[%c0_12, %c0_13], %12 {strides = array<i32>} : memref<256x64xf32, #tpu.memory_space<vmem>>, vector<256x64xf32>,
    } else {
    }
    return
  }
  func.func @transform_0(%arg0: i32, %arg1: i32, %arg2: i32) -> (i32, i32) {
    %c0_i32 = arith.constant 0 : i32
    return %arg0, %arg2 : i32, i32
  }
  func.func @transform_1(%arg0: i32, %arg1: i32, %arg2: i32) -> (i32, i32) {
    %c0_i32 = arith.constant 0 : i32
    return %arg2, %arg1 : i32, i32
  }
  func.func @transform_2(%arg0: i32, %arg1: i32, %arg2: i32) -> (i32, i32) {
    %c0_i32 = arith.constant 0 : i32
    return %arg0, %arg1 : i32, i32
  }
}

</mosaic_0001>

<bundles_post_ra>
// kernel: tpu_custom_call.1
= control target key start
LH: loop header
LB: loop body
LE: loop exit
PB: predicated region body
PF: predicated region fallthrough
CT: control target
= control target key end

     0   :  { %s1218_s9 = smov 0   ;;  %s1220_s10 = smov 0   ;;  %s1488_s0 = inlined_call_operand.vmem [shape: bf16[512,147], index: 0, kind: input, shape index: {}]   ;;  %s1489_s1 = inlined_call_operand.vmem [shape: bf16[147,64], index: 1, kind: input, shape index: {}]   ;;  %s1490_s2 = inlined_call_operand.vmem [shape: f32[512,64], index: 2, kind: output, shape index: {}]  }
   0x1   :  { %s1222_s11 = smov 0  }
   0x2 LB: > { %s31_s12 = sadd.s32 1, %s1194_s10  ;;  %p1004_p0 = scmp.ge.s32.totalorder %s1198_s11, 1  ;;  %s1198_s11 = sphi %s1222_s11, %s12_s11   ;;  %s1194_s10 = sphi %s1220_s10, %s1492_s10   ;;  %s1190_s9 = sphi %s1218_s9, %s1491_s9  }
   0x3   : > { %p33_p1 = scmp.ge.s32.totalorder %s31_s12, 2  ;;  %p158_p2 = scmp.lt.s32.totalorder %s1198_s11, 3 }
   0x5   : > { %s1494_s12 = smov (%p33_p1, %s31_s12), 0  ;;  %p159_p3 = pnand %p1004_p0, %p158_p2 }
   0x6   : > { %s1005_s19 = sshll.u32 (!%p159_p3), %s1190_s9, 5 }
   0x7   : > { %162 = sbr.rel (%p159_p3) target bundleno = 318 (0x13e), region = 28  ;;  %p198_p4 = scmp.lt.s32.totalorder (!%p159_p3), %s1005_s19, 63 }
   0xc   : > { %v1118_v0 = vld [vmem:[%s1489_s1 + $0x38] sm:$0xff]   ;;  %v1200_v1 = vmov 0   ;;  %v1119_v2 = vld [vmem:[%s1489_s1 + $0x30] sm:$0xff]   ;;  %v1120_v3 = vld [vmem:[%s1489_s1 + $0x28] sm:$0xff]   ;;  %s1496_s19 = smov (!%p198_p4, %s1005_s19), 63  ;;  %vm231_vm0 = vcmask 523264  }
   0xd   : > { %604 = vmatprep.subr.bf16.mxu0 %v1200_v1  ;;  %1071 = vmatprep.subr.bf16.mxu1 %v1200_v1  ;;  %v1121_v4 = vld [vmem:[%s1489_s1 + $0x20] sm:$0xff]   ;;  %s1070_s22 = sshll.u32 %s1496_s19, 3  ;;  %v1201_v5 = vmov 0.0   ;;  %v1122_v6 = vld [vmem:[%s1489_s1 + $0x18] sm:$0xff]   ;;  %vm548_vm1 = vcmask 154624   ;;  %v1123_v9 = vld [vmem:[%s1489_s1 + $0x10] sm:$0xff]  }
   0xe   : > { %605 = vmatpush1.bf16.msra.mxu0 %v1118_v0  ;;  %1081 = vmatpush1.bf16.msra.mxu1 %v1118_v0  ;;  %232 = vst.msk [vmem:[#allocation2] sm:$0xff] %vm231_vm0, %v1201_v5  ;;  %233 = vst.msk [vmem:[#allocation2 + $0x8] sm:$0xff] %vm231_vm0, %v1201_v5  ;;  %s1296_s25 = scalar_lea.vmem %s1488_s0, %s1070_s22  ;;  %vm597_vm2 = vcmask 1040384   ;;  %v1124_v10 = vld [vmem:[%s1489_s1 + $0x8] sm:$0xff]   ;;  %vm598_vm3 = vcmask 1041408   ;;  %v1202_v11 = vmov 65535   ;;  %s1385_s15 = scalar_lea.vmem %s1490_s2, %s1070_s22 }
   0xf   : > { %606 = vmatprep.subr.bf16.mxu0 %v1200_v1  ;;  %1072 = vmatprep.subr.bf16.mxu1 %v1200_v1  ;;  %234 = vst.msk [vmem:[#allocation2 + $0x10] sm:$0xff] %vm231_vm0, %v1201_v5  ;;  %235 = vst.msk [vmem:[#allocation2 + $0x18] sm:$0xff] %vm231_vm0, %v1201_v5  ;;  %v1130_v7 = vld [vmem:[%s1296_s25 + $0x4] ss:$8 sps:$4 sm:$0xff]   ;;  %v599_v12 = vsel %vm597_vm2, 4294967295, %v1202_v11 }
  0x10   : > { %236 = vst.msk [vmem:[#allocation2 + $0x20] sm:$0xff] %vm231_vm0, %v1201_v5  ;;  %237 = vst.msk [vmem:[#allocation2 + $0x28] sm:$0xff] %vm231_vm0, %v1201_v5  ;;  %v1133_v8 = vld [vmem:[%s1296_s25 + $0x84] ss:$8 sps:$4 sm:$0xff]   ;;  %1052 = vmatprep.mubr.msk.bf16.mxu0 %vm548_vm1, %v1130_v7  ;;  %v600_v15 = vsel %vm598_vm3, %v599_v12, 0 }
  0x11   : > { %238 = vst.msk [vmem:[#allocation2 + $0x30] sm:$0xff] %vm231_vm0, %v1201_v5  ;;  %239 = vst.msk [vmem:[#allocation2 + $0x38] sm:$0xff] %vm231_vm0, %v1201_v5  ;;  %1060 = vmatprep.mubr.msk.bf16.mxu1 %vm548_vm1, %v1133_v8  ;;  %v1125_v13 = vld [vmem:[%s1489_s1] sm:$0xff]   ;;  %v1126_v14 = vld [vmem:[%s1489_s1 + $0x48] ss:$0 sps:$4 sm:$0x33]  }
  0x12   : > { %607 = vmatpush1.bf16.msra.mxu0 %v1119_v2  ;;  %1082 = vmatpush1.bf16.msra.mxu1 %v1119_v2  ;;  %240 = vst.msk [vmem:[#allocation2 + $0x40] sm:$0xff] %vm231_vm0, %v1201_v5  ;;  %241 = vst.msk [vmem:[#allocation2 + $0x48] sm:$0xff] %vm231_vm0, %v1201_v5  ;;  %v602_v16 = vand.u32 %v1126_v14, %v600_v15  ;;  %v1127_v17 = vld [vmem:[%s1489_s1 + $0x40] sm:$0xff]   ;;  %v1134_v20 = vld [vmem:[%s1296_s25 + $0x14] ss:$8 sps:$4 sm:$0xff]  }
  0x13   : > { %608 = vmatprep.subr.bf16.mxu0 %v1200_v1  ;;  %1073 = vmatprep.subr.bf16.mxu1 %v1200_v1  ;;  %242 = vst.msk [vmem:[#allocation2 + $0x50] sm:$0xff] %vm231_vm0, %v1201_v5  ;;  %243 = vst.msk [vmem:[#allocation2 + $0x58] sm:$0xff] %vm231_vm0, %v1201_v5  ;;  %v1128_v18 = vld [vmem:[%s1296_s25] ss:$8 sps:$4 sm:$0xff]   ;;  %v1136_v21 = vld [vmem:[%s1296_s25 + $0x94] ss:$8 sps:$4 sm:$0xff]  }
  0x14   : > { %244 = vst.msk [vmem:[#allocation2 + $0x60] sm:$0xff] %vm231_vm0, %v1201_v5  ;;  %245 = vst.msk [vmem:[#allocation2 + $0x68] sm:$0xff] %vm231_vm0, %v1201_v5  ;;  %v1131_v19 = vld [vmem:[%s1296_s25 + $0x80] ss:$8 sps:$4 sm:$0xff]   ;;  %v1138_v22 = vld [vmem:[%s1296_s25 + $0x10] ss:$8 sps:$4 sm:$0xff]  }
  0x15   : > { %246 = vst.msk [vmem:[#allocation2 + $0x70] sm:$0xff] %vm231_vm0, %v1201_v5  ;;  %247 = vst.msk [vmem:[#allocation2 + $0x78] sm:$0xff] %vm231_vm0, %v1201_v5  ;;  %v1139_v23 = vld [vmem:[%s1296_s25 + $0x90] ss:$8 sps:$4 sm:$0xff]   ;;  %v1140_v24 = vld [vmem:[%s1296_s25 + $0x24] ss:$8 sps:$4 sm:$0xff]  }
  0x16   : > { %609 = vmatpush1.bf16.msra.mxu0 %v1120_v3  ;;  %1083 = vmatpush1.bf16.msra.mxu1 %v1120_v3  ;;  %248 = vst.msk [vmem:[#allocation2 + $0x80] sm:$0xff] %vm231_vm0, %v1201_v5  ;;  %249 = vst.msk [vmem:[#allocation2 + $0x88] sm:$0xff] %vm231_vm0, %v1201_v5  ;;  %v1142_v25 = vld [vmem:[%s1296_s25 + $0xa4] ss:$8 sps:$4 sm:$0xff]   ;;  %v1144_v26 = vld [vmem:[%s1296_s25 + $0x20] ss:$8 sps:$4 sm:$0xff]  }
  0x17   : > { %610 = vmatprep.subr.bf16.mxu0 %v1200_v1  ;;  %1074 = vmatprep.subr.bf16.mxu1 %v1200_v1  ;;  %250 = vst.msk [vmem:[#allocation2 + $0x90] sm:$0xff] %vm231_vm0, %v1201_v5  ;;  %251 = vst.msk [vmem:[#allocation2 + $0x98] sm:$0xff] %vm231_vm0, %v1201_v5  ;;  %v1145_v27 = vld [vmem:[%s1296_s25 + $0xa0] ss:$8 sps:$4 sm:$0xff]   ;;  %v1146_v28 = vld [vmem:[%s1296_s25 + $0x34] ss:$8 sps:$4 sm:$0xff]  }
  0x18   : > { %252 = vst.msk [vmem:[#allocation2 + $0xa0] sm:$0xff] %vm231_vm0, %v1201_v5  ;;  %253 = vst.msk [vmem:[#allocation2 + $0xa8] sm:$0xff] %vm231_vm0, %v1201_v5  ;;  %v1148_v29 = vld [vmem:[%s1296_s25 + $0xb4] ss:$8 sps:$4 sm:$0xff]   ;;  %v1150_v30 = vld [vmem:[%s1296_s25 + $0x30] ss:$8 sps:$4 sm:$0xff]  }
  0x19   : > { %254 = vst.msk [vmem:[#allocation2 + $0xb0] sm:$0xff] %vm231_vm0, %v1201_v5  ;;  %255 = vst.msk [vmem:[#allocation2 + $0xb8] sm:$0xff] %vm231_vm0, %v1201_v5  ;;  %v1151_v31 = vld [vmem:[%s1296_s25 + $0xb0] ss:$8 sps:$4 sm:$0xff]   ;;  %v1152_v32 = vld [vmem:[%s1296_s25 + $0x44] ss:$8 sps:$4 sm:$0xff]  }
  0x1a   : > { %256 = vst.msk [vmem:[#allocation2 + $0xc0] sm:$0xff] %vm231_vm0, %v1201_v5  ;;  %257 = vst.msk [vmem:[#allocation2 + $0xc8] sm:$0xff] %vm231_vm0, %v1201_v5  ;;  %611 = vmatpush1.bf16.msra.mxu0 %v1121_v4  ;;  %1084 = vmatpush1.bf16.msra.mxu1 %v1121_v4  ;;  %v1154_v33 = vld [vmem:[%s1296_s25 + $0xc4] ss:$8 sps:$4 sm:$0xff]   ;;  %v1156_v34 = vld [vmem:[%s1296_s25 + $0x40] ss:$8 sps:$4 sm:$0xff]  }
  0x1b   : > { %258 = vst.msk [vmem:[#allocation2 + $0xd0] sm:$0xff] %vm231_vm0, %v1201_v5  ;;  %259 = vst.msk [vmem:[#allocation2 + $0xd8] sm:$0xff] %vm231_vm0, %v1201_v5  ;;  %612 = vmatprep.subr.bf16.mxu0 %v1200_v1  ;;  %1075 = vmatprep.subr.bf16.mxu1 %v1200_v1  ;;  %v1157_v35 = vld [vmem:[%s1296_s25 + $0xc0] ss:$8 sps:$4 sm:$0xff]   ;;  %v1158_v36 = vld [vmem:[%s1296_s25 + $0x54] ss:$8 sps:$4 sm:$0xff]  }
  0x1c   : > { %260 = vst.msk [vmem:[#allocation2 + $0xe0] sm:$0xff] %vm231_vm0, %v1201_v5  ;;  %261 = vst.msk [vmem:[#allocation2 + $0xe8] sm:$0xff] %vm231_vm0, %v1201_v5  ;;  %v1160_v37 = vld [vmem:[%s1296_s25 + $0xd4] ss:$8 sps:$4 sm:$0xff]   ;;  %v1162_v38 = vld [vmem:[%s1296_s25 + $0x50] ss:$8 sps:$4 sm:$0xff]  }
  0x1d   : > { %262 = vst.msk [vmem:[#allocation2 + $0xf0] sm:$0xff] %vm231_vm0, %v1201_v5  ;;  %263 = vst.msk [vmem:[#allocation2 + $0xf8] sm:$0xff] %vm231_vm0, %v1201_v5  ;;  %v1163_v39 = vld [vmem:[%s1296_s25 + $0xd0] ss:$8 sps:$4 sm:$0xff]   ;;  %v1164_v40 = vld [vmem:[%s1296_s25 + $0x64] ss:$8 sps:$4 sm:$0xff]  }
  0x1e   : > { %613 = vmatpush1.bf16.msra.mxu0 %v1122_v6  ;;  %1085 = vmatpush1.bf16.msra.mxu1 %v1122_v6  ;;  %v1166_v41 = vld [vmem:[%s1296_s25 + $0xe4] ss:$8 sps:$4 sm:$0xff]   ;;  %v1168_v42 = vld [vmem:[%s1296_s25 + $0x60] ss:$8 sps:$4 sm:$0xff]   ;;  %v1170_v44 = vld [vmem:[%s1296_s25 + $0x74] ss:$8 sps:$4 sm:$0xff]  }
  0x1f   : > { %614 = vmatprep.subr.bf16.mxu0 %v1200_v1  ;;  %1076 = vmatprep.subr.bf16.mxu1 %v1200_v1  ;;  %v1169_v43 = vld [vmem:[%s1296_s25 + $0xe0] ss:$8 sps:$4 sm:$0xff]   ;;  %v1172_v45 = vld [vmem:[%s1296_s25 + $0xf4] ss:$8 sps:$4 sm:$0xff]   ;;  %v1174_v46 = vld [vmem:[%s1296_s25 + $0x70] ss:$8 sps:$4 sm:$0xff]  }
  0x20   : > { %v1175_v47 = vld [vmem:[%s1296_s25 + $0xf0] ss:$8 sps:$4 sm:$0xff]   ;;  %v264_v48 = vld [vmem:[#allocation2] sm:$0xff]  ;;  %v265_v56 = vld [vmem:[#allocation2 + $0x8] sm:$0xff] }
  0x21   : > { %v280_v49 = vld [vmem:[#allocation2 + $0x80] sm:$0xff]  ;;  %v281_v57 = vld [vmem:[#allocation2 + $0x88] sm:$0xff]  ;;  %v266_v0 = vld [vmem:[#allocation2 + $0x10] sm:$0xff] }
  0x22   : > { %615 = vmatpush1.bf16.msra.mxu0 %v1123_v9  ;;  %1086 = vmatpush1.bf16.msra.mxu1 %v1123_v9  ;;  %v267_v6 = vld [vmem:[#allocation2 + $0x18] sm:$0xff] }
  0x23   : > { %616 = vmatprep.subr.bf16.mxu0 %v1200_v1  ;;  %1077 = vmatprep.subr.bf16.mxu1 %v1200_v1  ;;  %v283_v11 = vld [vmem:[#allocation2 + $0x98] sm:$0xff] }
  0x26   : > { %617 = vmatpush1.bf16.msra.mxu0 %v1124_v10  ;;  %1087 = vmatpush1.bf16.msra.mxu1 %v1124_v10 }
  0x27   : > { %618 = vmatprep.subr.bf16.mxu0 %v1200_v1  ;;  %1078 = vmatprep.subr.bf16.mxu1 %v1200_v1 }
  0x2a   : > { %619 = vmatpush1.bf16.msra.mxu0 %v1125_v13  ;;  %1088 = vmatpush1.bf16.msra.mxu1 %v1125_v13 }
  0x2b   : > { %632 = vmatprep.subr.bf16.mxu0 %v1200_v1  ;;  %1079 = vmatprep.subr.bf16.mxu1 %v1200_v1 }
  0x2e   : > { %633 = vmatpush2.bf16.msra.mxu0 %v602_v16  ;;  %1089 = vmatpush2.bf16.msra.mxu1 %v602_v16  ;;  %v268_v16 = vld [vmem:[#allocation2 + $0x20] sm:$0xff] }
  0x2f   : > { %634 = vmatprep.subr.bf16.mxu0 %v1200_v1  ;;  %1080 = vmatprep.subr.bf16.mxu1 %v1200_v1  ;;  %v282_v1 = vld [vmem:[#allocation2 + $0x90] sm:$0xff] }
  0x32   : > { %635 = vmatpush2.bf16.msra.mxu0 %v1127_v17  ;;  %1090 = vmatpush2.bf16.msra.mxu1 %v1127_v17 }
  0x35   : > { %637 = vmatmul.mubr.bf16.vlgmr.msra.gmra.mxu0 %v1128_v18  ;;  %701 = vmatmul.mubr.bf16.vlgmr.msra.gmra.mxu1 %v1131_v19 }
  0x36   : > { %1053 = vmatprep.mubr.msk.bf16.mxu0 %vm548_vm1, %v1134_v20  ;;  %1061 = vmatprep.mubr.msk.bf16.mxu1 %vm548_vm1, %v1136_v21  ;;  %v284_v21 = vld [vmem:[#allocation2 + $0xa0] sm:$0xff] }
  0x3d   : > { %645 = vmatmul.mubr.bf16.gmra.mxu0 %v1138_v22  ;;  %709 = vmatmul.mubr.bf16.gmra.mxu1 %v1139_v23 }
  0x3e   : > { %1054 = vmatprep.mubr.msk.bf16.mxu0 %vm548_vm1, %v1140_v24  ;;  %1062 = vmatprep.mubr.msk.bf16.mxu1 %vm548_vm1, %v1142_v25 }
  0x45   : > { %653 = vmatmul.mubr.bf16.gmra.mxu0 %v1144_v26  ;;  %717 = vmatmul.mubr.bf16.gmra.mxu1 %v1145_v27  ;;  %v269_v26 = vld [vmem:[#allocation2 + $0x28] sm:$0xff] }
  0x46   : > { %1055 = vmatprep.mubr.msk.bf16.mxu0 %vm548_vm1, %v1146_v28  ;;  %1063 = vmatprep.mubr.msk.bf16.mxu1 %vm548_vm1, %v1148_v29 }
  0x4d   : > { %661 = vmatmul.mubr.bf16.gmra.mxu0 %v1150_v30  ;;  %725 = vmatmul.mubr.bf16.gmra.mxu1 %v1151_v31  ;;  %v285_v31 = vld [vmem:[#allocation2 + $0xa8] sm:$0xff] }
  0x4e   : > { %1056 = vmatprep.mubr.msk.bf16.mxu0 %vm548_vm1, %v1152_v32  ;;  %1064 = vmatprep.mubr.msk.bf16.mxu1 %vm548_vm1, %v1154_v33 }
  0x55   : > { %669 = vmatmul.mubr.bf16.gmra.mxu0 %v1156_v34  ;;  %733 = vmatmul.mubr.bf16.gmra.mxu1 %v1157_v35 }
  0x56   : > { %1057 = vmatprep.mubr.msk.bf16.mxu0 %vm548_vm1, %v1158_v36  ;;  %1065 = vmatprep.mubr.msk.bf16.mxu1 %vm548_vm1, %v1160_v37  ;;  %v270_v36 = vld [vmem:[#allocation2 + $0x30] sm:$0xff] }
  0x5d   : > { %677 = vmatmul.mubr.bf16.gmra.mxu0 %v1162_v38  ;;  %741 = vmatmul.mubr.bf16.gmra.mxu1 %v1163_v39 }
  0x5e   : > { %1058 = vmatprep.mubr.msk.bf16.mxu0 %vm548_vm1, %v1164_v40  ;;  %1066 = vmatprep.mubr.msk.bf16.mxu1 %vm548_vm1, %v1166_v41  ;;  %v286_v41 = vld [vmem:[#allocation2 + $0xb0] sm:$0xff] }
  0x65   : > { %685 = vmatmul.mubr.bf16.gmra.mxu0 %v1168_v42  ;;  %749 = vmatmul.mubr.bf16.gmra.mxu1 %v1169_v43 }
  0x66   : > { %1059 = vmatprep.mubr.msk.bf16.mxu0 %vm548_vm1, %v1170_v44  ;;  %1067 = vmatprep.mubr.msk.bf16.mxu1 %vm548_vm1, %v1172_v45 }
  0x6d   : > { %693 = vmatmul.mubr.bf16.gmra.mxu0 %v1174_v46  ;;  %757 = vmatmul.mubr.bf16.gmra.mxu1 %v1175_v47  ;;  %v271_v46 = vld [vmem:[#allocation2 + $0x38] sm:$0xff] }
  0xf5   : > { %v638_v50 = vpop.f32.mrf.mxu0  ;;  %v702_v51 = vpop.f32.mrf.mxu1 }
  0xf6   : > { %v765_v52 = vadd.f32 %v638_v50, %v264_v48  ;;  %v781_v53 = vadd.f32 %v702_v51, %v280_v49  ;;  %v287_v51 = vld [vmem:[#allocation2 + $0xb8] sm:$0xff] }
  0xf7   : > { %v640_v54 = vpop.f32.mrf.mxu0  ;;  %v704_v55 = vpop.f32.mrf.mxu1 }
  0xf8   : > { %798 = vst.msk [vmem:[#allocation2] sm:$0xff] %vm231_vm0, %v765_v52  ;;  %814 = vst.msk [vmem:[#allocation2 + $0x80] sm:$0xff] %vm231_vm0, %v781_v53 }
  0xf9   : > { %v641_v58 = vpop.f32.mrf.mxu0  ;;  %v705_v59 = vpop.f32.mrf.mxu1 }
  0xfa   : > { %v766_v60 = vadd.f32 %v641_v58, %v265_v56  ;;  %v782_v61 = vadd.f32 %v705_v59, %v281_v57  ;;  %v272_v56 = vld [vmem:[#allocation2 + $0x40] sm:$0xff] }
  0xfb   : > { %v643_v62 = vpop.f32.mrf.mxu0  ;;  %v707_v63 = vpop.f32.mrf.mxu1 }
  0xfc   : > { %799 = vst.msk [vmem:[#allocation2 + $0x8] sm:$0xff] %vm231_vm0, %v766_v60  ;;  %815 = vst.msk [vmem:[#allocation2 + $0x88] sm:$0xff] %vm231_vm0, %v782_v61  ;;  %v288_v61 = vld [vmem:[#allocation2 + $0xc0] sm:$0xff] }
  0xfd   : > { %v646_v2 = vpop.f32.mrf.mxu0  ;;  %v710_v3 = vpop.f32.mrf.mxu1 }
  0xfe   : > { %v767_v4 = vadd.f32 %v646_v2, %v266_v0  ;;  %v783_v5 = vadd.f32 %v710_v3, %v282_v1  ;;  %v273_v2 = vld [vmem:[#allocation2 + $0x48] sm:$0xff] }
  0xff   : > { %v833_v7 = vld [vmem:[#allocation2] sm:$0xff]  ;;  %v648_v9 = vpop.f32.mrf.mxu0  ;;  %v712_v10 = vpop.f32.mrf.mxu1 }
 0x100   : > { %v849_v8 = vld [vmem:[#allocation2 + $0x80] sm:$0xff]  ;;  %865 = vst.msk [vmem:[%s1385_s15] sm:$0xff] %vm231_vm0, %v833_v7  ;;  %800 = vst.msk [vmem:[#allocation2 + $0x10] sm:$0xff] %vm231_vm0, %v767_v4  ;;  %v289_v7 = vld [vmem:[#allocation2 + $0xc8] sm:$0xff] }
 0x101   : > { %881 = vst.msk [vmem:[%s1385_s15 + $0x80] sm:$0xff] %vm231_vm0, %v849_v8  ;;  %816 = vst.msk [vmem:[#allocation2 + $0x90] sm:$0xff] %vm231_vm0, %v783_v5  ;;  %v649_v12 = vpop.f32.mrf.mxu0  ;;  %v713_v13 = vpop.f32.mrf.mxu1 }
 0x102   : > { %v768_v14 = vadd.f32 %v649_v12, %v267_v6  ;;  %v784_v15 = vadd.f32 %v713_v13, %v283_v11  ;;  %v274_v12 = vld [vmem:[#allocation2 + $0x50] sm:$0xff] }
 0x103   : > { %v834_v17 = vld [vmem:[#allocation2 + $0x8] sm:$0xff]  ;;  %v651_v19 = vpop.f32.mrf.mxu0  ;;  %v715_v20 = vpop.f32.mrf.mxu1 }
 0x104   : > { %v850_v18 = vld [vmem:[#allocation2 + $0x88] sm:$0xff]  ;;  %866 = vst.msk [vmem:[%s1385_s15 + $0x8] sm:$0xff] %vm231_vm0, %v834_v17  ;;  %801 = vst.msk [vmem:[#allocation2 + $0x18] sm:$0xff] %vm231_vm0, %v768_v14  ;;  %v290_v17 = vld [vmem:[#allocation2 + $0xd0] sm:$0xff] }
 0x105   : > { %882 = vst.msk [vmem:[%s1385_s15 + $0x88] sm:$0xff] %vm231_vm0, %v850_v18  ;;  %817 = vst.msk [vmem:[#allocation2 + $0x98] sm:$0xff] %vm231_vm0, %v784_v15  ;;  %v654_v22 = vpop.f32.mrf.mxu0  ;;  %v718_v23 = vpop.f32.mrf.mxu1 }
 0x106   : > { %v769_v24 = vadd.f32 %v654_v22, %v268_v16  ;;  %v785_v25 = vadd.f32 %v718_v23, %v284_v21  ;;  %v275_v22 = vld [vmem:[#allocation2 + $0x58] sm:$0xff] }
 0x107   : > { %v835_v27 = vld [vmem:[#allocation2 + $0x10] sm:$0xff]  ;;  %v656_v29 = vpop.f32.mrf.mxu0  ;;  %v720_v30 = vpop.f32.mrf.mxu1 }
 0x108   : > { %v851_v28 = vld [vmem:[#allocation2 + $0x90] sm:$0xff]  ;;  %867 = vst.msk [vmem:[%s1385_s15 + $0x10] sm:$0xff] %vm231_vm0, %v835_v27  ;;  %802 = vst.msk [vmem:[#allocation2 + $0x20] sm:$0xff] %vm231_vm0, %v769_v24  ;;  %v291_v27 = vld [vmem:[#allocation2 + $0xd8] sm:$0xff] }
 0x109   : > { %883 = vst.msk [vmem:[%s1385_s15 + $0x90] sm:$0xff] %vm231_vm0, %v851_v28  ;;  %818 = vst.msk [vmem:[#allocation2 + $0xa0] sm:$0xff] %vm231_vm0, %v785_v25  ;;  %v657_v32 = vpop.f32.mrf.mxu0  ;;  %v721_v33 = vpop.f32.mrf.mxu1 }
 0x10a   : > { %v770_v34 = vadd.f32 %v657_v32, %v269_v26  ;;  %v786_v35 = vadd.f32 %v721_v33, %v285_v31  ;;  %v276_v32 = vld [vmem:[#allocation2 + $0x60] sm:$0xff] }
 0x10b   : > { %v836_v37 = vld [vmem:[#allocation2 + $0x18] sm:$0xff]  ;;  %v659_v39 = vpop.f32.mrf.mxu0  ;;  %v723_v40 = vpop.f32.mrf.mxu1 }
 0x10c   : > { %v852_v38 = vld [vmem:[#allocation2 + $0x98] sm:$0xff]  ;;  %868 = vst.msk [vmem:[%s1385_s15 + $0x18] sm:$0xff] %vm231_vm0, %v836_v37  ;;  %803 = vst.msk [vmem:[#allocation2 + $0x28] sm:$0xff] %vm231_vm0, %v770_v34  ;;  %v292_v37 = vld [vmem:[#allocation2 + $0xe0] sm:$0xff] }
 0x10d   : > { %884 = vst.msk [vmem:[%s1385_s15 + $0x98] sm:$0xff] %vm231_vm0, %v852_v38  ;;  %819 = vst.msk [vmem:[#allocation2 + $0xa8] sm:$0xff] %vm231_vm0, %v786_v35  ;;  %v662_v42 = vpop.f32.mrf.mxu0  ;;  %v726_v43 = vpop.f32.mrf.mxu1 }
 0x10e   : > { %v771_v44 = vadd.f32 %v662_v42, %v270_v36  ;;  %v787_v45 = vadd.f32 %v726_v43, %v286_v41  ;;  %v277_v42 = vld [vmem:[#allocation2 + $0x68] sm:$0xff] }
 0x10f   : > { %v837_v47 = vld [vmem:[#allocation2 + $0x20] sm:$0xff]  ;;  %v664_v49 = vpop.f32.mrf.mxu0  ;;  %v728_v50 = vpop.f32.mrf.mxu1 }
 0x110   : > { %v853_v48 = vld [vmem:[#allocation2 + $0xa0] sm:$0xff]  ;;  %869 = vst.msk [vmem:[%s1385_s15 + $0x20] sm:$0xff] %vm231_vm0, %v837_v47  ;;  %804 = vst.msk [vmem:[#allocation2 + $0x30] sm:$0xff] %vm231_vm0, %v771_v44  ;;  %v293_v47 = vld [vmem:[#allocation2 + $0xe8] sm:$0xff] }
 0x111   : > { %885 = vst.msk [vmem:[%s1385_s15 + $0xa0] sm:$0xff] %vm231_vm0, %v853_v48  ;;  %820 = vst.msk [vmem:[#allocation2 + $0xb0] sm:$0xff] %vm231_vm0, %v787_v45  ;;  %v665_v52 = vpop.f32.mrf.mxu0  ;;  %v729_v53 = vpop.f32.mrf.mxu1 }
 0x112   : > { %v772_v54 = vadd.f32 %v665_v52, %v271_v46  ;;  %v788_v55 = vadd.f32 %v729_v53, %v287_v51  ;;  %v278_v52 = vld [vmem:[#allocation2 + $0x70] sm:$0xff] }
 0x113   : > { %v838_v57 = vld [vmem:[#allocation2 + $0x28] sm:$0xff]  ;;  %v667_v59 = vpop.f32.mrf.mxu0  ;;  %v731_v60 = vpop.f32.mrf.mxu1 }
 0x114   : > { %v854_v58 = vld [vmem:[#allocation2 + $0xa8] sm:$0xff]  ;;  %870 = vst.msk [vmem:[%s1385_s15 + $0x28] sm:$0xff] %vm231_vm0, %v838_v57  ;;  %805 = vst.msk [vmem:[#allocation2 + $0x38] sm:$0xff] %vm231_vm0, %v772_v54  ;;  %v294_v57 = vld [vmem:[#allocation2 + $0xf0] sm:$0xff] }
 0x115   : > { %886 = vst.msk [vmem:[%s1385_s15 + $0xa8] sm:$0xff] %vm231_vm0, %v854_v58  ;;  %821 = vst.msk [vmem:[#allocation2 + $0xb8] sm:$0xff] %vm231_vm0, %v788_v55  ;;  %v670_v62 = vpop.f32.mrf.mxu0  ;;  %v734_v63 = vpop.f32.mrf.mxu1 }
 0x116   : > { %v773_v0 = vadd.f32 %v670_v62, %v272_v56  ;;  %v789_v1 = vadd.f32 %v734_v63, %v288_v61  ;;  %v279_v62 = vld [vmem:[#allocation2 + $0x78] sm:$0xff] }
 0x117   : > { %v839_v3 = vld [vmem:[#allocation2 + $0x30] sm:$0xff]  ;;  %v672_v5 = vpop.f32.mrf.mxu0  ;;  %v736_v6 = vpop.f32.mrf.mxu1 }
 0x118   : > { %v855_v4 = vld [vmem:[#allocation2 + $0xb0] sm:$0xff]  ;;  %871 = vst.msk [vmem:[%s1385_s15 + $0x30] sm:$0xff] %vm231_vm0, %v839_v3  ;;  %806 = vst.msk [vmem:[#allocation2 + $0x40] sm:$0xff] %vm231_vm0, %v773_v0  ;;  %v295_v3 = vld [vmem:[#allocation2 + $0xf8] sm:$0xff] }
 0x119   : > { %887 = vst.msk [vmem:[%s1385_s15 + $0xb0] sm:$0xff] %vm231_vm0, %v855_v4  ;;  %822 = vst.msk [vmem:[#allocation2 + $0xc0] sm:$0xff] %vm231_vm0, %v789_v1  ;;  %v673_v8 = vpop.f32.mrf.mxu0  ;;  %v737_v9 = vpop.f32.mrf.mxu1 }
 0x11a   : > { %v774_v10 = vadd.f32 %v673_v8, %v273_v2  ;;  %v790_v11 = vadd.f32 %v737_v9, %v289_v7 }
 0x11b   : > { %v840_v13 = vld [vmem:[#allocation2 + $0x38] sm:$0xff]  ;;  %v675_v15 = vpop.f32.mrf.mxu0  ;;  %v739_v16 = vpop.f32.mrf.mxu1 }
 0x11c   : > { %v856_v14 = vld [vmem:[#allocation2 + $0xb8] sm:$0xff]  ;;  %872 = vst.msk [vmem:[%s1385_s15 + $0x38] sm:$0xff] %vm231_vm0, %v840_v13  ;;  %807 = vst.msk [vmem:[#allocation2 + $0x48] sm:$0xff] %vm231_vm0, %v774_v10 }
 0x11d   : > { %888 = vst.msk [vmem:[%s1385_s15 + $0xb8] sm:$0xff] %vm231_vm0, %v856_v14  ;;  %823 = vst.msk [vmem:[#allocation2 + $0xc8] sm:$0xff] %vm231_vm0, %v790_v11  ;;  %v678_v18 = vpop.f32.mrf.mxu0  ;;  %v742_v19 = vpop.f32.mrf.mxu1 }
 0x11e   : > { %v775_v20 = vadd.f32 %v678_v18, %v274_v12  ;;  %v791_v21 = vadd.f32 %v742_v19, %v290_v17 }
 0x11f   : > { %v841_v23 = vld [vmem:[#allocation2 + $0x40] sm:$0xff]  ;;  %v680_v25 = vpop.f32.mrf.mxu0  ;;  %v744_v26 = vpop.f32.mrf.mxu1 }
 0x120   : > { %v857_v24 = vld [vmem:[#allocation2 + $0xc0] sm:$0xff]  ;;  %873 = vst.msk [vmem:[%s1385_s15 + $0x40] sm:$0xff] %vm231_vm0, %v841_v23  ;;  %808 = vst.msk [vmem:[#allocation2 + $0x50] sm:$0xff] %vm231_vm0, %v775_v20 }
 0x121   : > { %889 = vst.msk [vmem:[%s1385_s15 + $0xc0] sm:$0xff] %vm231_vm0, %v857_v24  ;;  %824 = vst.msk [vmem:[#allocation2 + $0xd0] sm:$0xff] %vm231_vm0, %v791_v21  ;;  %v681_v28 = vpop.f32.mrf.mxu0  ;;  %v745_v29 = vpop.f32.mrf.mxu1 }
 0x122   : > { %v776_v30 = vadd.f32 %v681_v28, %v275_v22  ;;  %v792_v31 = vadd.f32 %v745_v29, %v291_v27 }
 0x123   : > { %v842_v33 = vld [vmem:[#allocation2 + $0x48] sm:$0xff]  ;;  %v683_v35 = vpop.f32.mrf.mxu0  ;;  %v747_v36 = vpop.f32.mrf.mxu1 }
 0x124   : > { %v858_v34 = vld [vmem:[#allocation2 + $0xc8] sm:$0xff]  ;;  %874 = vst.msk [vmem:[%s1385_s15 + $0x48] sm:$0xff] %vm231_vm0, %v842_v33  ;;  %809 = vst.msk [vmem:[#allocation2 + $0x58] sm:$0xff] %vm231_vm0, %v776_v30 }
 0x125   : > { %890 = vst.msk [vmem:[%s1385_s15 + $0xc8] sm:$0xff] %vm231_vm0, %v858_v34  ;;  %825 = vst.msk [vmem:[#allocation2 + $0xd8] sm:$0xff] %vm231_vm0, %v792_v31  ;;  %v686_v38 = vpop.f32.mrf.mxu0  ;;  %v750_v39 = vpop.f32.mrf.mxu1 }
 0x126   : > { %v777_v40 = vadd.f32 %v686_v38, %v276_v32  ;;  %v793_v41 = vadd.f32 %v750_v39, %v292_v37 }
 0x127   : > { %v843_v43 = vld [vmem:[#allocation2 + $0x50] sm:$0xff]  ;;  %v688_v45 = vpop.f32.mrf.mxu0  ;;  %v752_v46 = vpop.f32.mrf.mxu1 }
 0x128   : > { %v859_v44 = vld [vmem:[#allocation2 + $0xd0] sm:$0xff]  ;;  %875 = vst.msk [vmem:[%s1385_s15 + $0x50] sm:$0xff] %vm231_vm0, %v843_v43  ;;  %810 = vst.msk [vmem:[#allocation2 + $0x60] sm:$0xff] %vm231_vm0, %v777_v40 }
 0x129   : > { %891 = vst.msk [vmem:[%s1385_s15 + $0xd0] sm:$0xff] %vm231_vm0, %v859_v44  ;;  %826 = vst.msk [vmem:[#allocation2 + $0xe0] sm:$0xff] %vm231_vm0, %v793_v41  ;;  %v689_v48 = vpop.f32.mrf.mxu0  ;;  %v753_v49 = vpop.f32.mrf.mxu1 }
 0x12a   : > { %v778_v50 = vadd.f32 %v689_v48, %v277_v42  ;;  %v794_v51 = vadd.f32 %v753_v49, %v293_v47 }
 0x12b   : > { %v844_v53 = vld [vmem:[#allocation2 + $0x58] sm:$0xff]  ;;  %v691_v55 = vpop.f32.mrf.mxu0  ;;  %v755_v56 = vpop.f32.mrf.mxu1 }
 0x12c   : > { %v860_v54 = vld [vmem:[#allocation2 + $0xd8] sm:$0xff]  ;;  %876 = vst.msk [vmem:[%s1385_s15 + $0x58] sm:$0xff] %vm231_vm0, %v844_v53  ;;  %811 = vst.msk [vmem:[#allocation2 + $0x68] sm:$0xff] %vm231_vm0, %v778_v50 }
 0x12d   : > { %892 = vst.msk [vmem:[%s1385_s15 + $0xd8] sm:$0xff] %vm231_vm0, %v860_v54  ;;  %827 = vst.msk [vmem:[#allocation2 + $0xe8] sm:$0xff] %vm231_vm0, %v794_v51  ;;  %v694_v58 = vpop.f32.mrf.mxu0  ;;  %v758_v59 = vpop.f32.mrf.mxu1 }
 0x12e   : > { %v779_v60 = vadd.f32 %v694_v58, %v278_v52  ;;  %v795_v61 = vadd.f32 %v758_v59, %v294_v57 }
 0x12f   : > { %v845_v63 = vld [vmem:[#allocation2 + $0x60] sm:$0xff]  ;;  %v696_v1 = vpop.f32.mrf.mxu0  ;;  %v760_v2 = vpop.f32.mrf.mxu1 }
 0x130   : > { %v861_v0 = vld [vmem:[#allocation2 + $0xe0] sm:$0xff]  ;;  %877 = vst.msk [vmem:[%s1385_s15 + $0x60] sm:$0xff] %vm231_vm0, %v845_v63  ;;  %812 = vst.msk [vmem:[#allocation2 + $0x70] sm:$0xff] %vm231_vm0, %v779_v60 }
 0x131   : > { %893 = vst.msk [vmem:[%s1385_s15 + $0xe0] sm:$0xff] %vm231_vm0, %v861_v0  ;;  %828 = vst.msk [vmem:[#allocation2 + $0xf0] sm:$0xff] %vm231_vm0, %v795_v61  ;;  %v697_v4 = vpop.f32.mrf.mxu0  ;;  %v761_v5 = vpop.f32.mrf.mxu1 }
 0x132   : > { %v780_v6 = vadd.f32 %v697_v4, %v279_v62  ;;  %v796_v7 = vadd.f32 %v761_v5, %v295_v3 }
 0x133   : > { %v846_v8 = vld [vmem:[#allocation2 + $0x68] sm:$0xff]  ;;  %v699_v10 = vpop.f32.mrf.mxu0  ;;  %v763_v11 = vpop.f32.mrf.mxu1 }
 0x134   : > { %v862_v9 = vld [vmem:[#allocation2 + $0xe8] sm:$0xff]  ;;  %878 = vst.msk [vmem:[%s1385_s15 + $0x68] sm:$0xff] %vm231_vm0, %v846_v8  ;;  %813 = vst.msk [vmem:[#allocation2 + $0x78] sm:$0xff] %vm231_vm0, %v780_v6 }
 0x135   : > { %894 = vst.msk [vmem:[%s1385_s15 + $0xe8] sm:$0xff] %vm231_vm0, %v862_v9  ;;  %829 = vst.msk [vmem:[#allocation2 + $0xf8] sm:$0xff] %vm231_vm0, %v796_v7 }
 0x137   : > { %v847_v12 = vld [vmem:[#allocation2 + $0x70] sm:$0xff] }
 0x138   : > { %v863_v13 = vld [vmem:[#allocation2 + $0xf0] sm:$0xff]  ;;  %879 = vst.msk [vmem:[%s1385_s15 + $0x70] sm:$0xff] %vm231_vm0, %v847_v12 }
 0x139   : > { %895 = vst.msk [vmem:[%s1385_s15 + $0xf0] sm:$0xff] %vm231_vm0, %v863_v13 }
 0x13b   : > { %v848_v14 = vld [vmem:[#allocation2 + $0x78] sm:$0xff] }
 0x13c   : > { %v864_v15 = vld [vmem:[#allocation2 + $0xf8] sm:$0xff]  ;;  %880 = vst.msk [vmem:[%s1385_s15 + $0x78] sm:$0xff] %vm231_vm0, %v848_v14 }
 0x13d   : > { %896 = vst.msk [vmem:[%s1385_s15 + $0xf8] sm:$0xff] %vm231_vm0, %v864_v15 }
 0x13e PF: > { %s12_s11 = sadd.s32 1, %s1198_s11   ;;  %s1491_s9 = smov %s1194_s10 }
 0x13f   : > { %p9_p5 = scmp.ge.s32.totalorder %s12_s11, 4   ;;  %s1492_s10 = smov %s1494_s12 }
 0x141   :  { %11 = sbr.rel (!%p9_p5) target bundleno = 2 (0x2), region = 69 }

</bundles_post_ra>
